<compile_context>
chip_gen: v5e
topology: v5e:2x2
jax: 0.10.0
libtpu: 0.0.40
codegen_flags: <defaults>
</compile_context>

<pallas_src>
import math

import jax
import jax.numpy as jnp
from jax.experimental import pallas as pl
from jax.experimental.pallas import tpu as pltpu


def make_encoder_layer_kernel(D, H):
    d_k = D // H
    scale = 1.0 / math.sqrt(d_k)
    eps = 1e-5

    def layer_norm(v, gamma, beta):
        mean = jnp.mean(v, axis=-1, keepdims=True)
        var = jnp.mean((v - mean) ** 2, axis=-1, keepdims=True)
        return (v - mean) * jax.lax.rsqrt(var + eps) * gamma + beta

    def split_heads(t):
        # (n, D) -> (H, n, d_k): single head-major relayout per tensor per tile
        # (the per-head lane slices happen once here, not inside the compute).
        return jnp.stack([t[:, h * d_k:(h + 1) * d_k] for h in range(H)], axis=0)

    def kernel(xq_ref, xkv_ref, amask_ref,
               wq_ref, bq_ref, wk_ref, bk_ref, wv_ref, bv_ref, wo_ref, bo_ref,
               g1_ref, be1_ref, w1_ref, b1_ref, w2_ref, b2_ref, g2_ref, be2_ref,
               y_ref, attn_ref):
        xq = xq_ref[0]            # (TQ, D) f32 query rows (residual path)
        xkv = xkv_ref[0]          # (S,  D) f32 full sequence (keys / values)
        amask = amask_ref[0]      # (TQ, S) f32 additive mask (0 keep / -1e4 drop)

        xq_bf = xq.astype(jnp.bfloat16)
        xkv_bf = xkv.astype(jnp.bfloat16)

        # --- Q/K/V projections: bf16 MXU operands, f32 accumulation ---
        q = jnp.dot(xq_bf, wq_ref[...],
                    preferred_element_type=jnp.float32) + bq_ref[...]
        q = q * scale             # fold 1/sqrt(d_k) into Q once
        k = jnp.dot(xkv_bf, wk_ref[...],
                    preferred_element_type=jnp.float32) + bk_ref[...]
        v = jnp.dot(xkv_bf, wv_ref[...],
                    preferred_element_type=jnp.float32) + bv_ref[...]

        qh = split_heads(q).astype(jnp.bfloat16)   # (H, TQ, d_k)
        kh = split_heads(k).astype(jnp.bfloat16)   # (H, S,  d_k)
        vh = split_heads(v).astype(jnp.bfloat16)   # (H, S,  d_k)

        # --- head-batched attention (mask + softmax emitted once) ---
        scores = jnp.einsum('hqd,hkd->hqk', qh, kh,
                            preferred_element_type=jnp.float32)     # (H, TQ, S)
        scores = scores + amask[None, :, :]
        m = jnp.max(scores, axis=-1, keepdims=True)
        p = jnp.exp(scores - m)
        denom = jnp.sum(p, axis=-1, keepdims=True)
        p = p * pl.reciprocal(denom, approx=True)                   # EUP, not VALU div
        out = jnp.einsum('hqk,hkd->hqd', p.astype(jnp.bfloat16), vh,
                         preferred_element_type=jnp.float32)        # (H, TQ, d_k)

        # Lane-dense per-head output: write (TQ, D) once; the wrapper reshapes
        # it back to the PyTorch (B, H, S, d_k) layout.
        combined = jnp.concatenate([out[h] for h in range(H)], axis=-1)  # (TQ, D)
        attn_ref[0] = combined

        # --- output projection + residual + LayerNorm ---
        attn_out = jnp.dot(combined.astype(jnp.bfloat16), wo_ref[...],
                           preferred_element_type=jnp.float32) + bo_ref[...]
        x1 = layer_norm(xq + attn_out, g1_ref[...], be1_ref[...])

        # --- position-wise feed-forward + residual + LayerNorm ---
        h1 = jnp.dot(x1.astype(jnp.bfloat16), w1_ref[...],
                     preferred_element_type=jnp.float32) + b1_ref[...]
        h1 = jnp.maximum(h1, 0.0)
        ff = jnp.dot(h1.astype(jnp.bfloat16), w2_ref[...],
                     preferred_element_type=jnp.float32) + b2_ref[...]
        y_ref[0] = layer_norm(x1 + ff, g2_ref[...], be2_ref[...])

    return kernel


def _pick_query_tile(S):
    if S <= 128:
        return S
    for t in (256, 128, 512):
        if S % t == 0:
            return t
    return S


def encoder_layer_pallas(x, mask, params, q_tile=None):
    """x: (B, S, D) f32; mask: (B, S, S) (nonzero == attend).

    Returns (y, attn) with y: (B, S, D), attn: (B, H, S, d_k) matching the
    PyTorch EncoderLayer.forward return (attn_probs == per-head attn output).
    """
    B, S, D = x.shape
    H = params["num_heads"]
    assert D % H == 0, "d_model must be divisible by num_heads"
    d_k = D // H
    d_ff = params["w1"].shape[1]

    tq = _pick_query_tile(S) if q_tile is None else q_tile
    assert S % tq == 0
    nq = S // tq

    # additive mask precomputed once outside the kernel (kernel just adds it)
    add_mask = jnp.where(mask != 0, 0.0, -10000.0).astype(jnp.float32)

    bf16 = lambda w: w.astype(jnp.bfloat16)
    f32 = lambda w: w.astype(jnp.float32)

    kernel = make_encoder_layer_kernel(D, H)

    def rep(shape):
        nd = len(shape)
        return pl.BlockSpec(shape, lambda b, qi, _nd=nd: (0,) * _nd)

    in_specs = [
        pl.BlockSpec((1, tq, D), lambda b, qi: (b, qi, 0)),   # x (query tile)
        pl.BlockSpec((1, S, D), lambda b, qi: (b, 0, 0)),     # x (full, for K/V)
        pl.BlockSpec((1, tq, S), lambda b, qi: (b, qi, 0)),   # additive mask
        rep((D, D)), rep((1, D)),                             # Wq, bq
        rep((D, D)), rep((1, D)),                             # Wk, bk
        rep((D, D)), rep((1, D)),                             # Wv, bv
        rep((D, D)), rep((1, D)),                             # Wo, bo
        rep((1, D)), rep((1, D)),                             # ln1 gamma / beta
        rep((D, d_ff)), rep((1, d_ff)),                       # fc1
        rep((d_ff, D)), rep((1, D)),                          # fc2
        rep((1, D)), rep((1, D)),                             # ln2 gamma / beta
    ]
    out_specs = [
        pl.BlockSpec((1, tq, D), lambda b, qi: (b, qi, 0)),   # y
        pl.BlockSpec((1, tq, D), lambda b, qi: (b, qi, 0)),   # combined heads
    ]
    out_shape = [
        jax.ShapeDtypeStruct((B, S, D), jnp.float32),
        jax.ShapeDtypeStruct((B, S, D), jnp.float32),
    ]

    fn = pl.pallas_call(
        kernel,
        out_shape=out_shape,
        grid_spec=pltpu.PrefetchScalarGridSpec(
            num_scalar_prefetch=0,
            grid=(B, nq),
            in_specs=in_specs,
            out_specs=out_specs,
        ),
        compiler_params=pltpu.CompilerParams(
            dimension_semantics=("parallel", "parallel"),
            # cover the resident bf16 weights + activation tiles; the scoped
            # default is only 16/32 MiB depending on chip generation.
            vmem_limit_bytes=48 * 1024 * 1024,
        ),
    )

    y, attn_flat = fn(
        f32(x), f32(x), add_mask,
        bf16(params["wq"]), f32(params["bq"]),
        bf16(params["wk"]), f32(params["bk"]),
        bf16(params["wv"]), f32(params["bv"]),
        bf16(params["wo"]), f32(params["bo"]),
        f32(params["g1"]), f32(params["be1"]),
        bf16(params["w1"]), f32(params["b1"]),
        bf16(params["w2"]), f32(params["b2"]),
        f32(params["g2"]), f32(params["be2"]),
    )
    # recover PyTorch's per-head attention output layout (B, H, S, d_k)
    attn = attn_flat.reshape(B, S, H, d_k).transpose(0, 2, 1, 3)
    return y, attn


def encoder_layer_ref(x, mask, params):
    """Pure-JAX f32 reference mirroring the PyTorch forward (dropout = identity)."""
    B, S, D = x.shape
    H = params["num_heads"]
    d_k = D // H

    q = x @ params["wq"] + params["bq"]
    k = x @ params["wk"] + params["bk"]
    v = x @ params["wv"] + params["bv"]

    def split(t):  # (B,S,D) -> (B,H,S,d_k)
        return t.reshape(B, S, H, d_k).transpose(0, 2, 1, 3)

    qh, kh, vh = split(q), split(k), split(v)
    scores = jnp.einsum("bhqd,bhkd->bhqk", qh, kh) / math.sqrt(d_k)
    scores = jnp.where(mask[:, None, :, :] != 0, scores, -10000.0)
    probs = jax.nn.softmax(scores, axis=-1)
    attn = jnp.einsum("bhqk,bhkd->bhqd", probs, vh)  # (B,H,S,d_k)
    combined = attn.transpose(0, 2, 1, 3).reshape(B, S, D)
    attn_out = combined @ params["wo"] + params["bo"]

    def ln(t, g, b):
        mu = jnp.mean(t, -1, keepdims=True)
        var = jnp.mean((t - mu) ** 2, -1, keepdims=True)
        return (t - mu) / jnp.sqrt(var + 1e-5) * g + b

    x1 = ln(x + attn_out, params["g1"], params["be1"])
    ff = jnp.maximum(x1 @ params["w1"] + params["b1"], 0.0) @ params["w2"] + params["b2"]
    x2 = ln(x1 + ff, params["g2"], params["be2"])
    return x2, attn


def init_params(key, D, H, d_ff):
    ks = jax.random.split(key, 8)
    s = 0.1
    p = {
        "num_heads": H,
        "wq": jax.random.normal(ks[0], (D, D), jnp.float32) * s,
        "wk": jax.random.normal(ks[1], (D, D), jnp.float32) * s,
        "wv": jax.random.normal(ks[2], (D, D), jnp.float32) * s,
        "wo": jax.random.normal(ks[3], (D, D), jnp.float32) * s,
        "bq": jax.random.normal(ks[4], (1, D), jnp.float32) * s,
        "bk": jax.random.normal(ks[5], (1, D), jnp.float32) * s,
        "bv": jax.random.normal(ks[6], (1, D), jnp.float32) * s,
        "bo": jax.random.normal(ks[7], (1, D), jnp.float32) * s,
        "w1": jax.random.normal(jax.random.fold_in(key, 10), (D, d_ff), jnp.float32) * s,
        "b1": jax.random.normal(jax.random.fold_in(key, 11), (1, d_ff), jnp.float32) * s,
        "w2": jax.random.normal(jax.random.fold_in(key, 12), (d_ff, D), jnp.float32) * s,
        "b2": jax.random.normal(jax.random.fold_in(key, 13), (1, D), jnp.float32) * s,
        "g1": jnp.ones((1, D), jnp.float32),
        "be1": jnp.zeros((1, D), jnp.float32),
        "g2": jnp.ones((1, D), jnp.float32),
        "be2": jnp.zeros((1, D), jnp.float32),
    }
    return p


if __name__ == "__main__":
    B, S, D, H, d_ff = 2, 8, 32, 4, 64
    key = jax.random.PRNGKey(0)
    kx, km, kp = jax.random.split(key, 3)

    x = jax.random.normal(kx, (B, S, D), jnp.float32)
    # causal-ish boolean mask, passed as float32 (nonzero == attend)
    mask = (jnp.tril(jnp.ones((S, S), jnp.float32))[None, :, :]
            * jnp.ones((B, 1, 1), jnp.float32))
    params = init_params(kp, D, H, d_ff)

    y, attn = encoder_layer_pallas(x, mask, params)
    y = jax.block_until_ready(y)
    attn = jax.block_until_ready(attn)

    y_ref, attn_ref = encoder_layer_ref(x, mask, params)
    # bf16 MXU operands with f32 accumulation + approx reciprocal -> compare
    # against the pure-f32 reference with a correspondingly loosened tolerance.
    assert jnp.allclose(y, y_ref, rtol=3e-2, atol=3e-2), (
        "output mismatch, max abs err = %f" % float(jnp.max(jnp.abs(y - y_ref))))
    assert jnp.allclose(attn, attn_ref, rtol=3e-2, atol=3e-2), (
        "attn mismatch, max abs err = %f" % float(jnp.max(jnp.abs(attn - attn_ref))))

    print("KERNEL_OK")
</pallas_src>

<mosaic_0001>
module attributes {stable_mosaic.version = 11 : i64} {
  func.func @kernel(%arg0: i32, %arg1: i32, %arg2: memref<1x8x32xf32, #tpu.memory_space<vmem>>, %arg3: memref<1x8x32xf32, #tpu.memory_space<vmem>>, %arg4: memref<1x8x8xf32, #tpu.memory_space<vmem>>, %arg5: memref<32x32xbf16, #tpu.memory_space<vmem>>, %arg6: memref<1x32xf32, #tpu.memory_space<vmem>>, %arg7: memref<32x32xbf16, #tpu.memory_space<vmem>>, %arg8: memref<1x32xf32, #tpu.memory_space<vmem>>, %arg9: memref<32x32xbf16, #tpu.memory_space<vmem>>, %arg10: memref<1x32xf32, #tpu.memory_space<vmem>>, %arg11: memref<32x32xbf16, #tpu.memory_space<vmem>>, %arg12: memref<1x32xf32, #tpu.memory_space<vmem>>, %arg13: memref<1x32xf32, #tpu.memory_space<vmem>>, %arg14: memref<1x32xf32, #tpu.memory_space<vmem>>, %arg15: memref<32x64xbf16, #tpu.memory_space<vmem>>, %arg16: memref<1x64xf32, #tpu.memory_space<vmem>>, %arg17: memref<64x32xbf16, #tpu.memory_space<vmem>>, %arg18: memref<1x32xf32, #tpu.memory_space<vmem>>, %arg19: memref<1x32xf32, #tpu.memory_space<vmem>>, %arg20: memref<1x32xf32, #tpu.memory_space<vmem>>, %arg21: memref<1x8x32xf32, #tpu.memory_space<vmem>>, %arg22: memref<1x8x32xf32, #tpu.memory_space<vmem>>) attributes {dimension_semantics = [#tpu.dimension_semantics<parallel>, #tpu.dimension_semantics<parallel>], iteration_bounds = array<i64: 2, 1>, scalar_prefetch = 0 : i64, scratch_operands = 0 : i64, tpu.core_type = #tpu.core_type<tc>, window_params = [{transform_indices = @transform_0, window_bounds = array<i64: 1, 8, 32>}, {transform_indices = @transform_1, window_bounds = array<i64: 1, 8, 32>}, {transform_indices = @transform_2, window_bounds = array<i64: 1, 8, 8>}, {pipeline_mode = #tpu.pipeline_mode<synchronous>, transform_indices = @transform_3, window_bounds = array<i64: 32, 32>}, {pipeline_mode = #tpu.pipeline_mode<synchronous>, transform_indices = @transform_4, window_bounds = array<i64: 1, 32>}, {pipeline_mode = #tpu.pipeline_mode<synchronous>, transform_indices = @transform_5, window_bounds = array<i64: 32, 32>}, {pipeline_mode = #tpu.pipeline_mode<synchronous>, transform_indices = @transform_6, window_bounds = array<i64: 1, 32>}, {pipeline_mode = #tpu.pipeline_mode<synchronous>, transform_indices = @transform_7, window_bounds = array<i64: 32, 32>}, {pipeline_mode = #tpu.pipeline_mode<synchronous>, transform_indices = @transform_8, window_bounds = array<i64: 1, 32>}, {pipeline_mode = #tpu.pipeline_mode<synchronous>, transform_indices = @transform_9, window_bounds = array<i64: 32, 32>}, {pipeline_mode = #tpu.pipeline_mode<synchronous>, transform_indices = @transform_10, window_bounds = array<i64: 1, 32>}, {pipeline_mode = #tpu.pipeline_mode<synchronous>, transform_indices = @transform_11, window_bounds = array<i64: 1, 32>}, {pipeline_mode = #tpu.pipeline_mode<synchronous>, transform_indices = @transform_12, window_bounds = array<i64: 1, 32>}, {pipeline_mode = #tpu.pipeline_mode<synchronous>, transform_indices = @transform_13, window_bounds = array<i64: 32, 64>}, {pipeline_mode = #tpu.pipeline_mode<synchronous>, transform_indices = @transform_14, window_bounds = array<i64: 1, 64>}, {pipeline_mode = #tpu.pipeline_mode<synchronous>, transform_indices = @transform_15, window_bounds = array<i64: 64, 32>}, {pipeline_mode = #tpu.pipeline_mode<synchronous>, transform_indices = @transform_16, window_bounds = array<i64: 1, 32>}, {pipeline_mode = #tpu.pipeline_mode<synchronous>, transform_indices = @transform_17, window_bounds = array<i64: 1, 32>}, {pipeline_mode = #tpu.pipeline_mode<synchronous>, transform_indices = @transform_18, window_bounds = array<i64: 1, 32>}, {transform_indices = @transform_19, window_bounds = array<i64: 1, 8, 32>}, {transform_indices = @transform_20, window_bounds = array<i64: 1, 8, 32>}]} {
    %c0 = arith.constant 0 : index
    %c0_0 = arith.constant 0 : index
    %c0_1 = arith.constant 0 : index
    %0 = vector.load %arg2[%c0, %c0_0, %c0_1] : memref<1x8x32xf32, #tpu.memory_space<vmem>>, vector<1x8x32xf32>
    %1 = vector.shape_cast %0 : vector<1x8x32xf32> to vector<8x32xf32>
    %c0_2 = arith.constant 0 : index
    %c0_3 = arith.constant 0 : index
    %c0_4 = arith.constant 0 : index
    %2 = vector.load %arg3[%c0_2, %c0_3, %c0_4] : memref<1x8x32xf32, #tpu.memory_space<vmem>>, vector<1x8x32xf32>
    %3 = vector.shape_cast %2 : vector<1x8x32xf32> to vector<8x32xf32>
    %c0_5 = arith.constant 0 : index
    %c0_6 = arith.constant 0 : index
    %c0_7 = arith.constant 0 : index
    %4 = vector.load %arg4[%c0_5, %c0_6, %c0_7] : memref<1x8x8xf32, #tpu.memory_space<vmem>>, vector<1x8x8xf32>
    %5 = vector.shape_cast %4 : vector<1x8x8xf32> to vector<8x8xf32>
    %6 = arith.truncf %1 : vector<8x32xf32> to vector<8x32xbf16>
    %7 = arith.truncf %3 : vector<8x32xf32> to vector<8x32xbf16>
    %c0_8 = arith.constant 0 : index
    %c0_9 = arith.constant 0 : index
    %8 = vector.load %arg5[%c0_8, %c0_9] : memref<32x32xbf16, #tpu.memory_space<vmem>>, vector<32x32xbf16>
    %cst = arith.constant dense<0.000000e+00> : vector<8x32xf32>
    %9 = tpu.matmul %6, %8, %cst {dimension_numbers = #tpu.dot_dimension_numbers<[1], [0], [0], [1], [0, 0, 1, 1], [], []>} : vector<8x32xbf16>, vector<32x32xbf16>, vector<8x32xf32> -> vector<8x32xf32>
    %c0_10 = arith.constant 0 : index
    %c0_11 = arith.constant 0 : index
    %10 = vector.load %arg6[%c0_10, %c0_11] : memref<1x32xf32, #tpu.memory_space<vmem>>, vector<1x32xf32>
    %11 = vector.broadcast %10 : vector<1x32xf32> to vector<8x32xf32>
    %12 = arith.addf %9, %11 : vector<8x32xf32>
    %cst_12 = arith.constant 0.353553385 : f32
    %13 = vector.broadcast %cst_12 : f32 to vector<8x32xf32>
    %14 = arith.mulf %12, %13 : vector<8x32xf32>
    %c0_13 = arith.constant 0 : index
    %c0_14 = arith.constant 0 : index
    %15 = vector.load %arg7[%c0_13, %c0_14] : memref<32x32xbf16, #tpu.memory_space<vmem>>, vector<32x32xbf16>
    %cst_15 = arith.constant dense<0.000000e+00> : vector<8x32xf32>
    %16 = tpu.matmul %7, %15, %cst_15 {dimension_numbers = #tpu.dot_dimension_numbers<[1], [0], [0], [1], [0, 0, 1, 1], [], []>} : vector<8x32xbf16>, vector<32x32xbf16>, vector<8x32xf32> -> vector<8x32xf32>
    %c0_16 = arith.constant 0 : index
    %c0_17 = arith.constant 0 : index
    %17 = vector.load %arg8[%c0_16, %c0_17] : memref<1x32xf32, #tpu.memory_space<vmem>>, vector<1x32xf32>
    %18 = vector.broadcast %17 : vector<1x32xf32> to vector<8x32xf32>
    %19 = arith.addf %16, %18 : vector<8x32xf32>
    %c0_18 = arith.constant 0 : index
    %c0_19 = arith.constant 0 : index
    %20 = vector.load %arg9[%c0_18, %c0_19] : memref<32x32xbf16, #tpu.memory_space<vmem>>, vector<32x32xbf16>
    %cst_20 = arith.constant dense<0.000000e+00> : vector<8x32xf32>
    %21 = tpu.matmul %7, %20, %cst_20 {dimension_numbers = #tpu.dot_dimension_numbers<[1], [0], [0], [1], [0, 0, 1, 1], [], []>} : vector<8x32xbf16>, vector<32x32xbf16>, vector<8x32xf32> -> vector<8x32xf32>
    %c0_21 = arith.constant 0 : index
    %c0_22 = arith.constant 0 : index
    %22 = vector.load %arg10[%c0_21, %c0_22] : memref<1x32xf32, #tpu.memory_space<vmem>>, vector<1x32xf32>
    %23 = vector.broadcast %22 : vector<1x32xf32> to vector<8x32xf32>
    %24 = arith.addf %21, %23 : vector<8x32xf32>
    %25 = vector.extract_strided_slice %14 {offsets = [0, 0], sizes = [8, 8], strides = [1, 1]} : vector<8x32xf32> to vector<8x8xf32>
    %26 = vector.extract_strided_slice %14 {offsets = [0, 8], sizes = [8, 8], strides = [1, 1]} : vector<8x32xf32> to vector<8x8xf32>
    %27 = vector.extract_strided_slice %14 {offsets = [0, 16], sizes = [8, 8], strides = [1, 1]} : vector<8x32xf32> to vector<8x8xf32>
    %28 = vector.extract_strided_slice %14 {offsets = [0, 24], sizes = [8, 8], strides = [1, 1]} : vector<8x32xf32> to vector<8x8xf32>
    %29 = vector.shape_cast %25 : vector<8x8xf32> to vector<1x8x8xf32>
    %30 = vector.shape_cast %26 : vector<8x8xf32> to vector<1x8x8xf32>
    %31 = vector.shape_cast %27 : vector<8x8xf32> to vector<1x8x8xf32>
    %32 = vector.shape_cast %28 : vector<8x8xf32> to vector<1x8x8xf32>
    %33 = tpu.concatenate %29, %30, %31, %32 in 0 : vector<1x8x8xf32>, vector<1x8x8xf32>, vector<1x8x8xf32>, vector<1x8x8xf32> -> vector<4x8x8xf32>
    %34 = arith.truncf %33 : vector<4x8x8xf32> to vector<4x8x8xbf16>
    %35 = vector.extract_strided_slice %19 {offsets = [0, 0], sizes = [8, 8], strides = [1, 1]} : vector<8x32xf32> to vector<8x8xf32>
    %36 = vector.extract_strided_slice %19 {offsets = [0, 8], sizes = [8, 8], strides = [1, 1]} : vector<8x32xf32> to vector<8x8xf32>
    %37 = vector.extract_strided_slice %19 {offsets = [0, 16], sizes = [8, 8], strides = [1, 1]} : vector<8x32xf32> to vector<8x8xf32>
    %38 = vector.extract_strided_slice %19 {offsets = [0, 24], sizes = [8, 8], strides = [1, 1]} : vector<8x32xf32> to vector<8x8xf32>
    %39 = vector.shape_cast %35 : vector<8x8xf32> to vector<1x8x8xf32>
    %40 = vector.shape_cast %36 : vector<8x8xf32> to vector<1x8x8xf32>
    %41 = vector.shape_cast %37 : vector<8x8xf32> to vector<1x8x8xf32>
    %42 = vector.shape_cast %38 : vector<8x8xf32> to vector<1x8x8xf32>
    %43 = tpu.concatenate %39, %40, %41, %42 in 0 : vector<1x8x8xf32>, vector<1x8x8xf32>, vector<1x8x8xf32>, vector<1x8x8xf32> -> vector<4x8x8xf32>
    %44 = arith.truncf %43 : vector<4x8x8xf32> to vector<4x8x8xbf16>
    %45 = vector.extract_strided_slice %24 {offsets = [0, 0], sizes = [8, 8], strides = [1, 1]} : vector<8x32xf32> to vector<8x8xf32>
    %46 = vector.extract_strided_slice %24 {offsets = [0, 8], sizes = [8, 8], strides = [1, 1]} : vector<8x32xf32> to vector<8x8xf32>
    %47 = vector.extract_strided_slice %24 {offsets = [0, 16], sizes = [8, 8], strides = [1, 1]} : vector<8x32xf32> to vector<8x8xf32>
    %48 = vector.extract_strided_slice %24 {offsets = [0, 24], sizes = [8, 8], strides = [1, 1]} : vector<8x32xf32> to vector<8x8xf32>
    %49 = vector.shape_cast %45 : vector<8x8xf32> to vector<1x8x8xf32>
    %50 = vector.shape_cast %46 : vector<8x8xf32> to vector<1x8x8xf32>
    %51 = vector.shape_cast %47 : vector<8x8xf32> to vector<1x8x8xf32>
    %52 = vector.shape_cast %48 : vector<8x8xf32> to vector<1x8x8xf32>
    %53 = tpu.concatenate %49, %50, %51, %52 in 0 : vector<1x8x8xf32>, vector<1x8x8xf32>, vector<1x8x8xf32>, vector<1x8x8xf32> -> vector<4x8x8xf32>
    %54 = arith.truncf %53 : vector<4x8x8xf32> to vector<4x8x8xbf16>
    "tpu.trace_start"() <{level = 10 : i32, message = "hqd,hkd->hqk"}> : () -> ()
    %cst_23 = arith.constant dense<0.000000e+00> : vector<4x8x8xf32>
    %55 = tpu.matmul %34, %44, %cst_23 {dimension_numbers = #tpu.dot_dimension_numbers<[2], [2], [1], [1], [0, 0, 0, 1, 1, 1], [0], [0]>} : vector<4x8x8xbf16>, vector<4x8x8xbf16>, vector<4x8x8xf32> -> vector<4x8x8xf32>
    "tpu.trace_stop"() : () -> ()
    %56 = vector.shape_cast %5 : vector<8x8xf32> to vector<1x8x8xf32>
    %57 = vector.broadcast %56 : vector<1x8x8xf32> to vector<4x8x8xf32>
    %58 = arith.addf %55, %57 : vector<4x8x8xf32>
    %cst_24 = arith.constant dense<0xFF800000> : vector<4x8xf32>
    %59 = vector.multi_reduction <maximumf>, %58, %cst_24 [2] : vector<4x8x8xf32> to vector<4x8xf32>
    %60 = vector.shape_cast %59 : vector<4x8xf32> to vector<4x8x1xf32>
    %61 = vector.broadcast %60 : vector<4x8x1xf32> to vector<4x8x8xf32>
    %62 = arith.subf %58, %61 : vector<4x8x8xf32>
    %63 = math.exp %62 : vector<4x8x8xf32>
    %cst_25 = arith.constant dense<0.000000e+00> : vector<4x8xf32>
    %64 = vector.multi_reduction <add>, %63, %cst_25 [2] : vector<4x8x8xf32> to vector<4x8xf32>
    %65 = vector.shape_cast %64 : vector<4x8xf32> to vector<4x8x1xf32>
    %66 = tpu.reciprocal %65 {approx = true} : vector<4x8x1xf32> -> vector<4x8x1xf32>
    %67 = vector.broadcast %66 : vector<4x8x1xf32> to vector<4x8x8xf32>
    %68 = arith.mulf %63, %67 : vector<4x8x8xf32>
    %69 = arith.truncf %68 : vector<4x8x8xf32> to vector<4x8x8xbf16>
    "tpu.trace_start"() <{level = 10 : i32, message = "hqk,hkd->hqd"}> : () -> ()
    %cst_26 = arith.constant dense<0.000000e+00> : vector<4x8x8xf32>
    %70 = tpu.matmul %69, %54, %cst_26 {dimension_numbers = #tpu.dot_dimension_numbers<[2], [1], [1], [2], [0, 0, 0, 1, 1, 2], [0], [0]>} : vector<4x8x8xbf16>, vector<4x8x8xbf16>, vector<4x8x8xf32> -> vector<4x8x8xf32>
    "tpu.trace_stop"() : () -> ()
    %71 = vector.extract_strided_slice %70 {offsets = [0, 0, 0], sizes = [1, 8, 8], strides = [1, 1, 1]} : vector<4x8x8xf32> to vector<1x8x8xf32>
    %72 = vector.shape_cast %71 : vector<1x8x8xf32> to vector<8x8xf32>
    %73 = vector.extract_strided_slice %70 {offsets = [1, 0, 0], sizes = [1, 8, 8], strides = [1, 1, 1]} : vector<4x8x8xf32> to vector<1x8x8xf32>
    %74 = vector.shape_cast %73 : vector<1x8x8xf32> to vector<8x8xf32>
    %75 = vector.extract_strided_slice %70 {offsets = [2, 0, 0], sizes = [1, 8, 8], strides = [1, 1, 1]} : vector<4x8x8xf32> to vector<1x8x8xf32>
    %76 = vector.shape_cast %75 : vector<1x8x8xf32> to vector<8x8xf32>
    %77 = vector.extract_strided_slice %70 {offsets = [3, 0, 0], sizes = [1, 8, 8], strides = [1, 1, 1]} : vector<4x8x8xf32> to vector<1x8x8xf32>
    %78 = vector.shape_cast %77 : vector<1x8x8xf32> to vector<8x8xf32>
    %79 = tpu.concatenate %72, %74, %76, %78 in 1 : vector<8x8xf32>, vector<8x8xf32>, vector<8x8xf32>, vector<8x8xf32> -> vector<8x32xf32>
    %c0_27 = arith.constant 0 : index
    %c0_28 = arith.constant 0 : index
    %c0_29 = arith.constant 0 : index
    %80 = vector.load %arg22[%c0_27, %c0_28, %c0_29] : memref<1x8x32xf32, #tpu.memory_space<vmem>>, vector<1x8x32xf32>
    %81 = vector.shape_cast %80 : vector<1x8x32xf32> to vector<8x32xf32>
    %82 = vector.shape_cast %79 : vector<8x32xf32> to vector<1x8x32xf32>
    tpu.vector_store %arg22[%c0_27, %c0_28, %c0_29], %82 {strides = array<i32>} : memref<1x8x32xf32, #tpu.memory_space<vmem>>, vector<1x8x32xf32>,
    %83 = arith.truncf %79 : vector<8x32xf32> to vector<8x32xbf16>
    %c0_30 = arith.constant 0 : index
    %c0_31 = arith.constant 0 : index
    %84 = vector.load %arg11[%c0_30, %c0_31] : memref<32x32xbf16, #tpu.memory_space<vmem>>, vector<32x32xbf16>
    %cst_32 = arith.constant dense<0.000000e+00> : vector<8x32xf32>
    %85 = tpu.matmul %83, %84, %cst_32 {dimension_numbers = #tpu.dot_dimension_numbers<[1], [0], [0], [1], [0, 0, 1, 1], [], []>} : vector<8x32xbf16>, vector<32x32xbf16>, vector<8x32xf32> -> vector<8x32xf32>
    %c0_33 = arith.constant 0 : index
    %c0_34 = arith.constant 0 : index
    %86 = vector.load %arg12[%c0_33, %c0_34] : memref<1x32xf32, #tpu.memory_space<vmem>>, vector<1x32xf32>
    %87 = vector.broadcast %86 : vector<1x32xf32> to vector<8x32xf32>
    %88 = arith.addf %85, %87 : vector<8x32xf32>
    %89 = arith.addf %1, %88 : vector<8x32xf32>
    %c0_35 = arith.constant 0 : index
    %c0_36 = arith.constant 0 : index
    %90 = vector.load %arg13[%c0_35, %c0_36] : memref<1x32xf32, #tpu.memory_space<vmem>>, vector<1x32xf32>
    %c0_37 = arith.constant 0 : index
    %c0_38 = arith.constant 0 : index
    %91 = vector.load %arg14[%c0_37, %c0_38] : memref<1x32xf32, #tpu.memory_space<vmem>>, vector<1x32xf32>
    %cst_39 = arith.constant dense<0.000000e+00> : vector<8xf32>
    %92 = vector.multi_reduction <add>, %89, %cst_39 [1] : vector<8x32xf32> to vector<8xf32>
    %93 = vector.shape_cast %92 : vector<8xf32> to vector<8x1xf32>
    %cst_40 = arith.constant 3.200000e+01 : f32
    %94 = vector.broadcast %cst_40 : f32 to vector<8x1xf32>
    %95 = arith.divf %93, %94 : vector<8x1xf32>
    %96 = vector.broadcast %95 : vector<8x1xf32> to vector<8x32xf32>
    %97 = arith.subf %89, %96 : vector<8x32xf32>
    %98 = arith.mulf %97, %97 : vector<8x32xf32>
    %cst_41 = arith.constant dense<0.000000e+00> : vector<8xf32>
    %99 = vector.multi_reduction <add>, %98, %cst_41 [1] : vector<8x32xf32> to vector<8xf32>
    %100 = vector.shape_cast %99 : vector<8xf32> to vector<8x1xf32>
    %cst_42 = arith.constant 3.200000e+01 : f32
    %101 = vector.broadcast %cst_42 : f32 to vector<8x1xf32>
    %102 = arith.divf %100, %101 : vector<8x1xf32>
    %103 = vector.broadcast %95 : vector<8x1xf32> to vector<8x32xf32>
    %104 = arith.subf %89, %103 : vector<8x32xf32>
    %cst_43 = arith.constant 9.99999974E-6 : f32
    %105 = vector.broadcast %cst_43 : f32 to vector<8x1xf32>
    %106 = arith.addf %102, %105 : vector<8x1xf32>
    %107 = math.rsqrt %106 : vector<8x1xf32>
    %108 = vector.broadcast %107 : vector<8x1xf32> to vector<8x32xf32>
    %109 = arith.mulf %104, %108 : vector<8x32xf32>
    %110 = vector.broadcast %90 : vector<1x32xf32> to vector<8x32xf32>
    %111 = arith.mulf %109, %110 : vector<8x32xf32>
    %112 = vector.broadcast %91 : vector<1x32xf32> to vector<8x32xf32>
    %113 = arith.addf %111, %112 : vector<8x32xf32>
    %114 = arith.truncf %113 : vector<8x32xf32> to vector<8x32xbf16>
    %c0_44 = arith.constant 0 : index
    %c0_45 = arith.constant 0 : index
    %115 = vector.load %arg15[%c0_44, %c0_45] : memref<32x64xbf16, #tpu.memory_space<vmem>>, vector<32x64xbf16>
    %cst_46 = arith.constant dense<0.000000e+00> : vector<8x64xf32>
    %116 = tpu.matmul %114, %115, %cst_46 {dimension_numbers = #tpu.dot_dimension_numbers<[1], [0], [0], [1], [0, 0, 1, 1], [], []>} : vector<8x32xbf16>, vector<32x64xbf16>, vector<8x64xf32> -> vector<8x64xf32>
    %c0_47 = arith.constant 0 : index
    %c0_48 = arith.constant 0 : index
    %117 = vector.load %arg16[%c0_47, %c0_48] : memref<1x64xf32, #tpu.memory_space<vmem>>, vector<1x64xf32>
    %118 = vector.broadcast %117 : vector<1x64xf32> to vector<8x64xf32>
    %119 = arith.addf %116, %118 : vector<8x64xf32>
    %cst_49 = arith.constant 0.000000e+00 : f32
    %120 = vector.broadcast %cst_49 : f32 to vector<8x64xf32>
    %121 = arith.maximumf %119, %120 : vector<8x64xf32>
    %122 = arith.truncf %121 : vector<8x64xf32> to vector<8x64xbf16>
    %c0_50 = arith.constant 0 : index
    %c0_51 = arith.constant 0 : index
    %123 = vector.load %arg17[%c0_50, %c0_51] : memref<64x32xbf16, #tpu.memory_space<vmem>>, vector<64x32xbf16>
    %cst_52 = arith.constant dense<0.000000e+00> : vector<8x32xf32>
    %124 = tpu.matmul %122, %123, %cst_52 {dimension_numbers = #tpu.dot_dimension_numbers<[1], [0], [0], [1], [0, 0, 1, 1], [], []>} : vector<8x64xbf16>, vector<64x32xbf16>, vector<8x32xf32> -> vector<8x32xf32>
    %c0_53 = arith.constant 0 : index
    %c0_54 = arith.constant 0 : index
    %125 = vector.load %arg18[%c0_53, %c0_54] : memref<1x32xf32, #tpu.memory_space<vmem>>, vector<1x32xf32>
    %126 = vector.broadcast %125 : vector<1x32xf32> to vector<8x32xf32>
    %127 = arith.addf %124, %126 : vector<8x32xf32>
    %128 = arith.addf %113, %127 : vector<8x32xf32>
    %c0_55 = arith.constant 0 : index
    %c0_56 = arith.constant 0 : index
    %129 = vector.load %arg19[%c0_55, %c0_56] : memref<1x32xf32, #tpu.memory_space<vmem>>, vector<1x32xf32>
    %c0_57 = arith.constant 0 : index
    %c0_58 = arith.constant 0 : index
    %130 = vector.load %arg20[%c0_57, %c0_58] : memref<1x32xf32, #tpu.memory_space<vmem>>, vector<1x32xf32>
    %cst_59 = arith.constant dense<0.000000e+00> : vector<8xf32>
    %131 = vector.multi_reduction <add>, %128, %cst_59 [1] : vector<8x32xf32> to vector<8xf32>
    %132 = vector.shape_cast %131 : vector<8xf32> to vector<8x1xf32>
    %cst_60 = arith.constant 3.200000e+01 : f32
    %133 = vector.broadcast %cst_60 : f32 to vector<8x1xf32>
    %134 = arith.divf %132, %133 : vector<8x1xf32>
    %135 = vector.broadcast %134 : vector<8x1xf32> to vector<8x32xf32>
    %136 = arith.subf %128, %135 : vector<8x32xf32>
    %137 = arith.mulf %136, %136 : vector<8x32xf32>
    %cst_61 = arith.constant dense<0.000000e+00> : vector<8xf32>
    %138 = vector.multi_reduction <add>, %137, %cst_61 [1] : vector<8x32xf32> to vector<8xf32>
    %139 = vector.shape_cast %138 : vector<8xf32> to vector<8x1xf32>
    %cst_62 = arith.constant 3.200000e+01 : f32
    %140 = vector.broadcast %cst_62 : f32 to vector<8x1xf32>
    %141 = arith.divf %139, %140 : vector<8x1xf32>
    %142 = vector.broadcast %134 : vector<8x1xf32> to vector<8x32xf32>
    %143 = arith.subf %128, %142 : vector<8x32xf32>
    %cst_63 = arith.constant 9.99999974E-6 : f32
    %144 = vector.broadcast %cst_63 : f32 to vector<8x1xf32>
    %145 = arith.addf %141, %144 : vector<8x1xf32>
    %146 = math.rsqrt %145 : vector<8x1xf32>
    %147 = vector.broadcast %146 : vector<8x1xf32> to vector<8x32xf32>
    %148 = arith.mulf %143, %147 : vector<8x32xf32>
    %149 = vector.broadcast %129 : vector<1x32xf32> to vector<8x32xf32>
    %150 = arith.mulf %148, %149 : vector<8x32xf32>
    %151 = vector.broadcast %130 : vector<1x32xf32> to vector<8x32xf32>
    %152 = arith.addf %150, %151 : vector<8x32xf32>
    %c0_64 = arith.constant 0 : index
    %c0_65 = arith.constant 0 : index
    %c0_66 = arith.constant 0 : index
    %153 = vector.load %arg21[%c0_64, %c0_65, %c0_66] : memref<1x8x32xf32, #tpu.memory_space<vmem>>, vector<1x8x32xf32>
    %154 = vector.shape_cast %153 : vector<1x8x32xf32> to vector<8x32xf32>
    %155 = vector.shape_cast %152 : vector<8x32xf32> to vector<1x8x32xf32>
    tpu.vector_store %arg21[%c0_64, %c0_65, %c0_66], %155 {strides = array<i32>} : memref<1x8x32xf32, #tpu.memory_space<vmem>>, vector<1x8x32xf32>,
    return
  }
  func.func @transform_0(%arg0: i32, %arg1: i32) -> (i32, i32, i32) {
    %c0_i32 = arith.constant 0 : i32
    %c0_i32_0 = arith.constant 0 : i32
    return %arg0, %arg1, %c0_i32 : i32, i32, i32
  }
  func.func @transform_1(%arg0: i32, %arg1: i32) -> (i32, i32, i32) {
    %c0_i32 = arith.constant 0 : i32
    %c0_i32_0 = arith.constant 0 : i32
    %c0_i32_1 = arith.constant 0 : i32
    return %arg0, %c0_i32, %c0_i32_0 : i32, i32, i32
  }
  func.func @transform_2(%arg0: i32, %arg1: i32) -> (i32, i32, i32) {
    %c0_i32 = arith.constant 0 : i32
    %c0_i32_0 = arith.constant 0 : i32
    return %arg0, %arg1, %c0_i32 : i32, i32, i32
  }
  func.func @transform_3(%arg0: i32, %arg1: i32) -> (i32, i32) {
    %c0_i32 = arith.constant 0 : i32
    %c0_i32_0 = arith.constant 0 : i32
    %c0_i32_1 = arith.constant 0 : i32
    return %c0_i32, %c0_i32_0 : i32, i32
  }
  func.func @transform_4(%arg0: i32, %arg1: i32) -> (i32, i32) {
    %c0_i32 = arith.constant 0 : i32
    %c0_i32_0 = arith.constant 0 : i32
    %c0_i32_1 = arith.constant 0 : i32
    return %c0_i32, %c0_i32_0 : i32, i32
  }
  func.func @transform_5(%arg0: i32, %arg1: i32) -> (i32, i32) {
    %c0_i32 = arith.constant 0 : i32
    %c0_i32_0 = arith.constant 0 : i32
    %c0_i32_1 = arith.constant 0 : i32
    return %c0_i32, %c0_i32_0 : i32, i32
  }
  func.func @transform_6(%arg0: i32, %arg1: i32) -> (i32, i32) {
    %c0_i32 = arith.constant 0 : i32
    %c0_i32_0 = arith.constant 0 : i32
    %c0_i32_1 = arith.constant 0 : i32
    return %c0_i32, %c0_i32_0 : i32, i32
  }
  func.func @transform_7(%arg0: i32, %arg1: i32) -> (i32, i32) {
    %c0_i32 = arith.constant 0 : i32
    %c0_i32_0 = arith.constant 0 : i32
    %c0_i32_1 = arith.constant 0 : i32
    return %c0_i32, %c0_i32_0 : i32, i32
  }
  func.func @transform_8(%arg0: i32, %arg1: i32) -> (i32, i32) {
    %c0_i32 = arith.constant 0 : i32
    %c0_i32_0 = arith.constant 0 : i32
    %c0_i32_1 = arith.constant 0 : i32
    return %c0_i32, %c0_i32_0 : i32, i32
  }
  func.func @transform_9(%arg0: i32, %arg1: i32) -> (i32, i32) {
    %c0_i32 = arith.constant 0 : i32
    %c0_i32_0 = arith.constant 0 : i32
    %c0_i32_1 = arith.constant 0 : i32
    return %c0_i32, %c0_i32_0 : i32, i32
  }
  func.func @transform_10(%arg0: i32, %arg1: i32) -> (i32, i32) {
    %c0_i32 = arith.constant 0 : i32
    %c0_i32_0 = arith.constant 0 : i32
    %c0_i32_1 = arith.constant 0 : i32
    return %c0_i32, %c0_i32_0 : i32, i32
  }
  func.func @transform_11(%arg0: i32, %arg1: i32) -> (i32, i32) {
    %c0_i32 = arith.constant 0 : i32
    %c0_i32_0 = arith.constant 0 : i32
    %c0_i32_1 = arith.constant 0 : i32
    return %c0_i32, %c0_i32_0 : i32, i32
  }
  func.func @transform_12(%arg0: i32, %arg1: i32) -> (i32, i32) {
    %c0_i32 = arith.constant 0 : i32
    %c0_i32_0 = arith.constant 0 : i32
    %c0_i32_1 = arith.constant 0 : i32
    return %c0_i32, %c0_i32_0 : i32, i32
  }
  func.func @transform_13(%arg0: i32, %arg1: i32) -> (i32, i32) {
    %c0_i32 = arith.constant 0 : i32
    %c0_i32_0 = arith.constant 0 : i32
    %c0_i32_1 = arith.constant 0 : i32
    return %c0_i32, %c0_i32_0 : i32, i32
  }
  func.func @transform_14(%arg0: i32, %arg1: i32) -> (i32, i32) {
    %c0_i32 = arith.constant 0 : i32
    %c0_i32_0 = arith.constant 0 : i32
    %c0_i32_1 = arith.constant 0 : i32
    return %c0_i32, %c0_i32_0 : i32, i32
  }
  func.func @transform_15(%arg0: i32, %arg1: i32) -> (i32, i32) {
    %c0_i32 = arith.constant 0 : i32
    %c0_i32_0 = arith.constant 0 : i32
    %c0_i32_1 = arith.constant 0 : i32
    return %c0_i32, %c0_i32_0 : i32, i32
  }
  func.func @transform_16(%arg0: i32, %arg1: i32) -> (i32, i32) {
    %c0_i32 = arith.constant 0 : i32
    %c0_i32_0 = arith.constant 0 : i32
    %c0_i32_1 = arith.constant 0 : i32
    return %c0_i32, %c0_i32_0 : i32, i32
  }
  func.func @transform_17(%arg0: i32, %arg1: i32) -> (i32, i32) {
    %c0_i32 = arith.constant 0 : i32
    %c0_i32_0 = arith.constant 0 : i32
    %c0_i32_1 = arith.constant 0 : i32
    return %c0_i32, %c0_i32_0 : i32, i32
  }
  func.func @transform_18(%arg0: i32, %arg1: i32) -> (i32, i32) {
    %c0_i32 = arith.constant 0 : i32
    %c0_i32_0 = arith.constant 0 : i32
    %c0_i32_1 = arith.constant 0 : i32
    return %c0_i32, %c0_i32_0 : i32, i32
  }
  func.func @transform_19(%arg0: i32, %arg1: i32) -> (i32, i32, i32) {
    %c0_i32 = arith.constant 0 : i32
    %c0_i32_0 = arith.constant 0 : i32
    return %arg0, %arg1, %c0_i32 : i32, i32, i32
  }
  func.func @transform_20(%arg0: i32, %arg1: i32) -> (i32, i32, i32) {
    %c0_i32 = arith.constant 0 : i32
    %c0_i32_0 = arith.constant 0 : i32
    return %arg0, %arg1, %c0_i32 : i32, i32, i32
  }
}

</mosaic_0001>

<bundles_post_ra>
// kernel: tpu_custom_call.1
= control target key start
LH: loop header
LB: loop body
LE: loop exit
PB: predicated region body
PF: predicated region fallthrough
CT: control target
= control target key end

     0   :  { %s2534_s0 = inlined_call_operand.vmem [shape: f32[2,8,32], index: 0, kind: input, shape index: {}]   ;;  %s2535_s1 = inlined_call_operand.vmem [shape: f32[2,8,32], index: 1, kind: input, shape index: {}]   ;;  %s2536_s2 = inlined_call_operand.vmem [shape: f32[2,8,8], index: 2, kind: input, shape index: {}]   ;;  %s2537_s3 = inlined_call_operand.hbm [shape: bf16[32,32], index: 3, kind: input, shape index: {}]   ;;  %s2538_s4 = inlined_call_operand.vmem [shape: f32[1,32], index: 4, kind: input, shape index: {}]   ;;  %s2539_s5 = inlined_call_operand.hbm [shape: bf16[32,32], index: 5, kind: input, shape index: {}]   ;;  %s2540_s6 = inlined_call_operand.vmem [shape: f32[1,32], index: 6, kind: input, shape index: {}]   ;;  %s2541_s7 = inlined_call_operand.hbm [shape: bf16[32,32], index: 7, kind: input, shape index: {}]   ;;  %s2542_s8 = inlined_call_operand.vmem [shape: f32[1,32], index: 8, kind: input, shape index: {}]   ;;  %s2543_s9 = inlined_call_operand.hbm [shape: bf16[32,32], index: 9, kind: input, shape index: {}]   ;;  %s2544_s10 = inlined_call_operand.vmem [shape: f32[1,32], index: 10, kind: input, shape index: {}]   ;;  %s2545_s11 = inlined_call_operand.vmem [shape: f32[1,32], index: 11, kind: input, shape index: {}]   ;;  %s2546_s12 = inlined_call_operand.vmem [shape: f32[1,32], index: 12, kind: input, shape index: {}]   ;;  %s2547_s13 = inlined_call_operand.hbm [shape: bf16[32,64], index: 13, kind: input, shape index: {}]   ;;  %s2548_s14 = inlined_call_operand.vmem [shape: f32[1,64], index: 14, kind: input, shape index: {}]   ;;  %s2549_s15 = inlined_call_operand.vmem [shape: bf16[64,32], index: 15, kind: input, shape index: {}]   ;;  %s2550_s16 = inlined_call_operand.vmem [shape: f32[1,32], index: 16, kind: input, shape index: {}]   ;;  %s2551_s17 = inlined_call_operand.vmem [shape: f32[1,32], index: 17, kind: input, shape index: {}]   ;;  %s2552_s18 = inlined_call_operand.vmem [shape: f32[1,32], index: 18, kind: input, shape index: {}]   ;;  %s2553_s19 = inlined_call_operand.hbm [shape: f32[2,8,32], index: 19, kind: output, shape index: {0}]   ;;  %s2554_s20 = inlined_call_operand.hbm [shape: f32[2,8,32], index: 20, kind: output, shape index: {1}]  }
   0x1   :  { %2566 = sst [smem:[#allocation27_spill]] %s2534_s0 }
   0x2   :  { %2567 = sst [smem:[#allocation28_spill]] %s2535_s1 }
   0x3   :  { %2568 = sst [smem:[#allocation29_spill]] %s2536_s2 }
   0x4   :  { %2569 = sst [smem:[#allocation30_spill]] %s2537_s3 }
   0x5   :  { %2570 = sst [smem:[#allocation31_spill]] %s2538_s4 }
   0x6   :  { %2571 = sst [smem:[#allocation32_spill]] %s2539_s5 }
   0x7   :  { %2572 = sst [smem:[#allocation33_spill]] %s2543_s9 }
   0x8   :  { %2573 = sst [smem:[#allocation34_spill]] %s2551_s17 }
   0x9   :  { %2574 = sst [smem:[#allocation35_spill]] %s2552_s18 }
   0xa   :  { %2575 = sst [smem:[#allocation36_spill]] %s2553_s19 }
   0xb   :  { %2576 = sst [smem:[#allocation37_spill]] %s2554_s20 }
   0xc   :  { %26 = vsyncpa [#allocation3], 0 }
   0xd   :  { %27 = vsyncpa [#allocation6], 0 }
   0xe   :  { %28 = vsyncpa [#allocation9], 0 }
   0xf   :  { %29 = vsyncpa [#allocation4], 0 }
  0x10   :  { %31 = vsyncpa [#allocation4 + $0x1], 0 }
  0x11   :  { %32 = vsyncpa [#allocation13], 0 }
  0x12   :  { %34 = vsyncpa [#allocation13 + $0x1], 0  ;;  %s2243_s1 = smov 0   ;;  %s2245_s22 = smov 0  }
  0x13   :  { %s2247_s23 = smov 0   ;;  %s2249_s24 = smov 0  }
  0x14   :  { %s2251_s2 = smov 0   ;;  %s2253_s25 = smov 0  }
  0x15 LB: > { %2577 = sst [smem:[#allocation19_spill]] %s2102_s1  ;;  %s1588_s3 = sadd.s32 4294967295, %s2122_s25   ;;  %s2122_s25 = sphi %s2253_s25, %s40_s25   ;;  %s2118_s2 = sphi %s2251_s2, %s2609_s2   ;;  %s2114_s24 = sphi %s2249_s24, %s2608_s24   ;;  %s2110_s23 = sphi %s2247_s23, %s2607_s23   ;;  %s2106_s22 = sphi %s2245_s22, %s2611_s22   ;;  %s2102_s1 = sphi %s2243_s1, %s2610_s1  }
  0x16   : > { %2578 = sst [smem:[#allocation20_spill]] %s2110_s23  ;;  %s1589_s26 = sadd.s32 4294967294, %s2122_s25  }
  0x17   : > { %2579 = sst [smem:[#allocation21_spill]] %s2118_s2  ;;  %s52_s27 = sadd.s32 1, %s2118_s2 }
  0x18   : > { %2580 = sst [smem:[#allocation22_spill]] %s2122_s25  ;;  %s479_s28 = sadd.s32 1, %s2110_s23 }
  0x19   : > { %p54_p0 = scmp.ge.s32.totalorder %s52_s27, 2  ;;  %p489_p1 = scmp.ne.s32.totalorder %s2110_s23, %s2106_s22 }
  0x1a   : > { %p490_p2 = scmp.eq.s32.totalorder %s1588_s3, 1  ;;  %p495_p3 = scmp.ne.s32.totalorder %s2106_s22, %s2102_s1 }
  0x1b   : > { %s2613_s27 = smov (%p54_p0, %s52_s27), 0  ;;  %p496_p5 = scmp.eq.s32.totalorder %s1589_s26, 1 }
  0x1c   : > { %2581 = sst [smem:[#allocation23_spill]] %s2613_s27  ;;  %p2283_p4 = por %p490_p2, %p489_p1 }
  0x1d   : > { %s474_s29 = ssub.s32 %s2118_s2, %s2613_s27  ;;  %p1590_p6 = scmp.ge.s32.totalorder %s2122_s25, 1 }
  0x1e   : > { %s2582_s4 = scalar_select %p2283_p4, 1, 0 }
  0x1f   : > { %p477_p7 = scmp.eq.s32.totalorder %s474_s29, 0  ;;  %p2290_p8 = por %p496_p5, %p495_p3 }
  0x20   : > { %2583 = sst [smem:[#allocation24_spill]] %s2582_s4  ;;  %p531_p9 = scmp.lt.s32.totalorder %s2122_s25, 3 }
  0x21   : > { %s2584_s30 = scalar_select %p2290_p8, 1, 0 }
  0x22   : > { %s2296_s0 = scalar_select %p477_p7, %s2110_s23, %s479_s28  }
  0x23   : > { %2585 = sst [smem:[#allocation25_spill]] %s2584_s30  ;;  %p2298_p10 = pnand %p1590_p6, %p531_p9 }
  0x24   : > { %2586 = sst [smem:[#allocation26_spill]] %s2296_s0  ;;  %p2302_p11 = scmp.eq.s32.totalorder %s1588_s3, 0 }
  0x25   : > { %p1722_p12 = pneg %p2298_p10  ;;  %s2589_s5 = sld [smem:[#allocation32_spill]] }
  0x26   : > { %s2124_s2 = smov [#allocation5]   ;;  %s2591_s9 = sld [smem:[#allocation33_spill]] }
  0x27   : > { %p2313_p13 = pnand %p2302_p11, %p1722_p12  ;;  %s561_s3 = sshll.u32 %s2124_s2, 4  ;;  %s562_s3 = int_to_ptr.vmem [resolvable:$true] %s561_s3 }
  0x28   : > { %s2125_s25 = smov 64   ;;  %s2126_s26 = smov 4  }
  0x29   : > { %s2127_s29 = smov [#allocation8]   ;;  %s2592_s17 = sld [smem:[#allocation30_spill]] }
  0x2a   : > { %s2128_s23 = smov [#allocation2]   ;;  %s576_s4 = sshll.u32 %s2541_s7, 4  ;;  %s577_s4 = int_to_ptr.hbm [resolvable:$true] %s576_s4 }
  0x2b   : > { %s559_s27 = sshll.u32 %s2589_s5, 4  ;;  %s595_s5 = sshll.u32 %s2127_s29, 4  ;;  %s560_s27 = int_to_ptr.hbm [resolvable:$true] %s559_s27  ;;  %s596_s5 = int_to_ptr.vmem [resolvable:$true] %s595_s5 }
  0x2c   : > { %s593_s30 = sshll.u32 %s2591_s9, 4  ;;  %s544_s2 = sshll.u32 %s2128_s23, 4  ;;  %s594_s30 = int_to_ptr.hbm [resolvable:$true] %s593_s30  ;;  %s545_s2 = int_to_ptr.vmem [resolvable:$true] %s544_s2 }
  0x2d   : > { %1728 = dma.hbm_to_vmem [thread:$0]  (!%p2313_p13), %s560_s27, 256, %s562_s3, [#allocation6], %s2125_s25, %s2125_s25, %s2126_s26  }
  0x2e   : > { %1734 = dma.hbm_to_vmem [thread:$0]  (!%p2313_p13), %s594_s30, 256, %s596_s5, [#allocation9], %s2125_s25, %s2125_s25, %s2126_s26  }
  0x2f   : > { %s542_s20 = sshll.u32 %s2592_s17, 4  ;;  %s616_s29 = sshll.u32 %s2547_s13, 4  ;;  %s543_s20 = int_to_ptr.hbm [resolvable:$true] %s542_s20  ;;  %s617_s29 = int_to_ptr.hbm [resolvable:$true] %s616_s29 }
  0x30   : > { %1725 = dma.hbm_to_vmem [thread:$0]  (!%p2313_p13), %s543_s20, 256, %s545_s2, [#allocation3], %s2125_s25, %s2125_s25, %s2126_s26  }
  0x31   : > { %s2129_s18 = smov [#allocation7]   ;;  %s2130_s5 = smov [#allocation10]  }
  0x32   : > { %s578_s17 = sshll.u32 %s2129_s18, 4  ;;  %s618_s19 = sshll.u32 %s2130_s5, 4  ;;  %s579_s17 = int_to_ptr.vmem [resolvable:$true] %s578_s17  ;;  %s619_s19 = int_to_ptr.vmem [resolvable:$true] %s618_s19 }
  0x33   : > { %1731 = dma.hbm_to_vmem [thread:$0]  (!%p2313_p13), %s577_s4, 256, %s579_s17, [#allocation6], %s2125_s25, %s2125_s25, %s2126_s26  }
  0x34   : > { %1737 = dma.hbm_to_vmem [thread:$0]  (!%p2313_p13), %s617_s29, 256, %s619_s19, [#allocation9], %s2125_s25, %s2125_s25, %s2126_s26  }
  0x35   : > { %676 = sbr.rel (%p2298_p10) target bundleno = 1921 (0x781), region = 96 }
  0x3a   : > { %2081 = dma.done.wait (%p2302_p11), [#allocation3], 256  }
  0x3b   : > { %2083 = vsyncadd (%p2302_p11), [#allocation3], 4294967040 }
  0x3c   : > { %2085 = dma.done.wait (%p2302_p11), [#allocation6], 512  }
  0x3d   : > { %2087 = vsyncadd (%p2302_p11), [#allocation6], 4294966784 }
  0x3e   : > { %2089 = dma.done.wait (%p2302_p11), [#allocation9], 512  }
  0x3f   : > { %2091 = vsyncadd (%p2302_p11), [#allocation9], 4294966784  ;;  %p773_p0 = scmp.lt.s32.totalorder %s2114_s24, 1  ;;  %s2593_s30 = sld [smem:[#allocation27_spill]]  ;;  %v1685_v0 = vld [vmem:[#allocation2 + $0x8] sm:$0xff]  ;;  %v1687_v1 = vld [vmem:[#allocation5 + $0x8] sm:$0xff] }
  0x40   : > { %s2594_s23 = sld [smem:[#allocation28_spill]]  ;;  %v1684_v2 = vld [vmem:[#allocation2] sm:$0xff]  ;;  %v1686_v3 = vld [vmem:[#allocation5] sm:$0xff]  ;;  %827 = vmatpush.bf16.msra.mxu0 %v1685_v0  ;;  %864 = vmatpush.bf16.msra.mxu1 %v1687_v1  ;;  %vm817_vm0 = vcmask 261120   ;;  %vm946_vm1 = vcmask 64512   ;;  %s2131_s18 = smov 120  }
  0x41   : > { %s774_s9 = scalar_select %p773_p0, %s2114_s24, 1  ;;  %v1819_v9 = vld [vmem:[%s2540_s6] ss:$0 sm:$0xff]  ;;  %v1689_v20 = vld [vmem:[#allocation7 + $0x8] sm:$0xff]  ;;  %vm1074_vm2 = vcmask 1043456   ;;  %vm1161_vm3 = vcmask 130048  }
  0x42   : > { %s2595_s27 = sld [smem:[#allocation31_spill]]  ;;  %s2132_s17 = smov 104   ;;  %897 = vmatpush.bf16.msra.mxu2 %v1689_v20  ;;  %v1688_v21 = vld [vmem:[#allocation7] sm:$0xff]  ;;  %vm1163_vm4 = vcmask 195584   ;;  %vm1318_vm9 = vcmask 523264  }
  0x43   : > { %s2355_s20 = sshll.u32 %s774_s9, 3  ;;  %s2133_s5 = smov 112   ;;  %v1820_v39 = vld [vmem:[%s2542_s8] ss:$0 sm:$0xff] }
  0x44   : > { %828 = vmatpush.bf16.msra.mxu0 %v1684_v2  ;;  %865 = vmatpush.bf16.msra.mxu1 %v1686_v3  ;;  %s2135_s28 = smov 8   ;;  %s2136_s26 = smov 24  }
  0x45   : > { %s779_s21 = scalar_lea.vmem %s2593_s30, %s2355_s20  ;;  %s2596_s30 = sld [smem:[#allocation29_spill]] }
  0x46   : > { %s783_s2 = scalar_lea.vmem %s2594_s23, %s2355_s20  ;;  %v2365_v4 = vld [vmem:[%s779_s21] sm:$0xff]  ;;  %898 = vmatpush.bf16.msra.mxu2 %v1688_v21  ;;  %s2419_s23 = sand.u32 1, %s2106_s22  }
  0x47   : > { %v793_v5 = vld [vmem:[%s783_s2] sm:$0xff]  ;;  %v795_v6 = vpack.c.bf16 %v2365_v4, %v2365_v4  ;;  %s1603_s2 = sshll.u32 %s2419_s23, 3  ;;  %s1680_s29 = sshll.u32 %s2114_s24, 3 }
  0x48   : > { %v796_v7 = vpack.c.bf16 %v793_v5, %v793_v5  ;;  %v1818_v8 = vld [vmem:[%s2595_s27] ss:$0 sm:$0xff]  ;;  %s2425_s1 = scalar_lea.vmem [#allocation12], %s1603_s2  ;;  %s1375_s4 = scalar_lea.sflag [#allocation13], %s2419_s23 }
  0x49   : > { %1616 = vmatmul.msk.bf16.vlgmr.msra.gmra.mxu0 %vm817_vm0, %v795_v6  ;;  %s1403_s9 = sshll.u32 %s2425_s1, 4  ;;  %s1404_s9 = int_to_ptr.vmem [resolvable:$true] %s1403_s9 }
  0x4a   : > { %1625 = vmatmul.msk.bf16.vlgmr.msra.gmra.mxu1 %vm817_vm0, %v796_v7  ;;  %1634 = vmatmul.msk.bf16.vlgmr.msra.gmra.mxu2 %vm817_vm0, %v796_v7 }
  0x4b   : > { %s790_s21 = scalar_lea.vmem %s2596_s30, %s2355_s20  ;;  %s2134_s20 = smov 16  }
  0x4c   : > { %v794_v45 = vld [vmem:[%s790_s21] sm:$0xff] }
  0xc6   : > { %v830_v10 = vpop.f32.mrf.mxu0 }
  0xc7   : > { %v867_v11 = vpop.f32.mrf.mxu1  ;;  %v831_v12 = vadd.f32 %v1818_v8, %v830_v10 }
  0xc8   : > { %v868_v13 = vadd.f32 %v1819_v9, %v867_v11 }
  0xc9   : > { %v834_v14 = vmul.f32 0.35355338, %v831_v12 }
  0xca   : > { %919 = vrot.lane.b32.xlu1 %v868_v13, %s2131_s18  ;;  %925 = vrot.lane.b32.xlu0 %v868_v13, %s2132_s17  ;;  %v928_v15 = vpack.c.bf16 %v868_v13, %v868_v13 }
  0xcb   : > { %905 = vrot.lane.b32.xlu2 %v834_v14, %s2131_s18  ;;  %v914_v19 = vpack.c.bf16 %v834_v14, %v834_v14 }
  0xcc   : > { %v951_v16 = vsel %vm946_vm1, %v928_v15, 0 }
  0xcd   : > { %960 = vmatpush.bf16.xpose.msra.mxu3 %v951_v16  ;;  %v900_v40 = vpop.f32.mrf.mxu2 }
  0xce   : > { %v832_v17 = vpop.f32.mrf.mxu0  ;;  %v901_v41 = vadd.f32 %v1820_v39, %v900_v40 }
  0xcf   : > { %v869_v18 = vpop.f32.mrf.mxu1 }
  0xd0   : > { %v942_v42 = vpack.c.bf16 %v901_v41, %v901_v41 }
  0xd2   : > { %922 = vrot.lane.b32.xlu1 %v868_v13, %s2133_s5  ;;  %911 = vrot.lane.b32.xlu0 %v834_v14, %s2132_s17  ;;  %v1076_v43 = vsel %vm1074_vm2, %v942_v42, 0 }
  0xd3   : > { %908 = vrot.lane.b32.xlu2 %v834_v14, %s2133_s5 }
  0xd4   : > { %1635 = vmatmul.msk.bf16.vlgmr.msra.gmra.mxu3 %vm946_vm1, %v914_v19 }
  0xd5   : > { %1085 = vmatpush.bf16.msrb.mxu3 %v1076_v43  ;;  %v902_v44 = vpop.f32.mrf.mxu2 }
 0x125   : > { %v906_v28 = vpop.permute.xlu2 %905 }
 0x126   : > { %v915_v31 = vpack.c.bf16 %v906_v28, %v906_v28 }
 0x12d   : > { %v909_v35 = vpop.permute.xlu2 %908 }
 0x12e   : > { %v916_v36 = vpack.c.bf16 %v909_v35, %v909_v35 }
 0x13c   : > { %v920_v22 = vpop.permute.xlu1 %919  ;;  %v926_v23 = vpop.permute.xlu0 %925 }
 0x13d   : > { %v929_v24 = vpack.c.bf16 %v920_v22, %v920_v22  ;;  %v931_v25 = vpack.c.bf16 %v926_v23, %v926_v23 }
 0x13f   : > { %v970_v26 = vsel %vm946_vm1, %v929_v24, 0  ;;  %v1008_v27 = vsel %vm946_vm1, %v931_v25, 0 }
 0x140   : > { %979 = vmatpush.bf16.xpose.msrb.mxu0 %v970_v26  ;;  %1017 = vmatpush.bf16.xpose.msrb.mxu2 %v1008_v27 }
 0x144   : > { %v923_v29 = vpop.permute.xlu1 %922  ;;  %v912_v30 = vpop.permute.xlu0 %911 }
 0x145   : > { %v930_v32 = vpack.c.bf16 %v923_v29, %v923_v29  ;;  %v917_v33 = vpack.c.bf16 %v912_v30, %v912_v30 }
 0x147   : > { %1636 = vmatmul.msk.bf16.vlgmr.msrb.gmra.mxu0 %vm946_vm1, %v915_v31  ;;  %1638 = vmatmul.msk.bf16.vlgmr.msrb.gmra.mxu2 %vm946_vm1, %v917_v33  ;;  %v989_v34 = vsel %vm946_vm1, %v930_v32, 0 }
 0x148   : > { %998 = vmatpush.bf16.xpose.msrb.mxu1 %v989_v34 }
 0x14f   : > { %1637 = vmatmul.msk.bf16.vlgmr.msrb.gmra.mxu1 %vm946_vm1, %v916_v36 }
 0x157   : > { %v962_v37 = vpop.f32.mrf.mxu3 }
 0x158   : > { %v963_v57 = vadd.f32 %v962_v37, %v794_v45 }
 0x15a   : > { %v1023_v59 = vsel %vm946_vm1, %v963_v57, -inf }
 0x15f   : > { %v964_v38 = vpop.f32.mrf.mxu3 }
 0x1c4   : > { %v981_v46 = vpop.f32.mrf.mxu0 }
 0x1c5   : > { %v982_v47 = vadd.f32 %v981_v46, %v794_v45 }
 0x1c7   : > { %v1026_v48 = vsel %vm946_vm1, %v982_v47, -inf }
 0x1c8   : > { %1027 = vmax.xlane.f32.xlu1 %v1026_v48 }
 0x1ca   : > { %v1019_v49 = vpop.f32.mrf.mxu2 }
 0x1cb   : > { %v1020_v50 = vadd.f32 %v1019_v49, %v794_v45 }
 0x1cc   : > { %v983_v51 = vpop.f32.mrf.mxu0  ;;  %v1000_v52 = vpop.f32.mrf.mxu1 }
 0x1cd   : > { %v1001_v53 = vadd.f32 %v1000_v52, %v794_v45  ;;  %v1032_v54 = vsel %vm946_vm1, %v1020_v50, -inf  ;;  %v1690_v51 = vld [vmem:[#allocation8] sm:$0xff] }
 0x1ce   : > { %1033 = vmax.xlane.f32.xlu0 %v1032_v54 }
 0x1cf   : > { %v1029_v55 = vsel %vm946_vm1, %v1001_v53, -inf }
 0x1d0   : > { %1030 = vmax.xlane.f32.xlu2 %v1029_v55 }
 0x1d2   : > { %v1021_v56 = vpop.f32.mrf.mxu2 }
 0x1d4   : > { %v1002_v58 = vpop.f32.mrf.mxu1 }
 0x1d8   : > { %1024 = vmax.xlane.f32.xlu2 %v1023_v59  ;;  %v1821_v59 = vld [vmem:[%s2544_s10] ss:$0 sm:$0xff] }
 0x23b   : > { %v1028_v60 = vpop.xlane.xlu1 %1027 }
 0x23c   : > { %v1036_v61 = vsub.f32 %v982_v47, %v1028_v60 }
 0x23e   : > { %v1041_v62 = vmul.f32 1.442695, %v1036_v61 }
 0x240   : > { %1828 = vpow2.f32 %v1041_v62 }
 0x241   : > { %v1034_v63 = vpop.xlane.xlu0 %1033 }
 0x242   : > { %v1038_v0 = vsub.f32 %v1020_v50, %v1034_v63  ;;  %v1691_v50 = vld [vmem:[#allocation8 + $0x8] sm:$0xff] }
 0x243   : > { %v1031_v1 = vpop.xlane.xlu2 %1030  ;;  %1196 = vmatpush.bf16.msra.mxu3 %v1691_v50 }
 0x244   : > { %v1045_v2 = vmul.f32 1.442695, %v1038_v0  ;;  %v1037_v3 = vsub.f32 %v1001_v53, %v1031_v1  ;;  %v2137_v1 = vmov 32.0  }
 0x246   : > { %v1829_v5 = vpop.eup %1828  ;;  %1830 = vpow2.f32 %v1045_v2  ;;  %v1043_v6 = vmul.f32 1.442695, %v1037_v3 }
 0x247   : > { %v1050_v7 = vsel %vm946_vm1, %v1829_v5, 0.0  ;;  %1197 = vmatpush.bf16.msra.mxu3 %v1690_v51 }
 0x248   : > { %1832 = vpow2.f32 %v1043_v6  ;;  %1051 = vadd.xlane.f32.xlu1 %v1050_v7 }
 0x24b   : > { %v1025_v12 = vpop.xlane.xlu2 %1024 }
 0x24c   : > { %v1831_v8 = vpop.eup %1830  ;;  %v1035_v13 = vsub.f32 %v963_v57, %v1025_v12 }
 0x24d   : > { %v1056_v9 = vsel %vm946_vm1, %v1831_v8, 0.0 }
 0x24e   : > { %v1833_v10 = vpop.eup %1832  ;;  %1057 = vadd.xlane.f32.xlu0 %v1056_v9  ;;  %v1039_v14 = vmul.f32 1.442695, %v1035_v13  ;;  %v1693_v13 = vld [vmem:[#allocation10 + $0x8] sm:$0xff] }
 0x24f   : > { %v1053_v11 = vsel %vm946_vm1, %v1833_v10, 0.0 }
 0x250   : > { %1054 = vadd.xlane.f32.xlu2 %v1053_v11  ;;  %1834 = vpow2.f32 %v1039_v14  ;;  %v1692_v14 = vld [vmem:[#allocation10] sm:$0xff] }
 0x256   : > { %v1835_v15 = vpop.eup %1834 }
 0x257   : > { %v1047_v16 = vsel %vm946_vm1, %v1835_v15, 0.0 }
 0x261   : > { %933 = vrot.lane.b32.xlu1 %v901_v41, %s2131_s18 }
 0x262   : > { %939 = vrot.lane.b32.xlu0 %v901_v41, %s2132_s17 }
 0x268   : > { %936 = vrot.lane.b32.xlu2 %v901_v41, %s2133_s5  ;;  %s2598_s5 = sld [smem:[#allocation37_spill]] }
 0x26e   : > { %s1401_s19 = scalar_lea.hbm %s2598_s5, %s1680_s29 }
 0x26f   : > { %s1405_s25 = sshll.u32 %s1401_s19, 4  ;;  %s1406_s25 = int_to_ptr.hbm [resolvable:$true] %s1405_s25 }
 0x270   : > { %s2014_s30 = sshra.s32 %s1406_s25, 4  ;;  %s2015_s30 = int_to_ptr.hbm [resolvable:$true] %s2014_s30 }
 0x271   : > { %s2016_s21 = scalar_lea.hbm %s2015_s30, 8  ;;  %p2021_p5 = scmp.lt.s32.totalorder %s2015_s30, %s2598_s5 }
 0x272   : > { %p2017_p1 = scmp.ne.s32.totalorder %s2015_s30, %s2016_s21 }
 0x274   : > { %p2018_p2 = pnand %p2017_p1, %p2283_p4 }
 0x276   : > { %p2019_p3 = pneg %p2018_p2 }
 0x28c   : > { %1048 = vadd.xlane.f32.xlu0 %v1047_v16 }
 0x2bb   : > { %v1052_v18 = vpop.xlane.xlu1 %1051 }
 0x2c1   : > { %v1058_v19 = vpop.xlane.xlu0 %1057 }
 0x2c3   : > { %v1055_v17 = vpop.xlane.xlu2 %1054 }
 0x2c4   : > { %1836 = vrcp.f32 %v1055_v17 }
 0x2c5   : > { %1838 = vrcp.f32 %v1052_v18  ;;  %v1696_v18 = vld [vmem:[%s2549_s15 + $0x10] sm:$0xff] }
 0x2c6   : > { %1840 = vrcp.f32 %v1058_v19 }
 0x2ca   : > { %v1837_v20 = vpop.eup %1836 }
 0x2cb   : > { %v937_v21 = vpop.permute.xlu2 %936  ;;  %v1065_v22 = vmul.f32 %v1837_v20, %v1833_v10  ;;  %v1839_v26 = vpop.eup %1838 }
 0x2cc   : > { %v944_v23 = vpack.c.bf16 %v937_v21, %v937_v21  ;;  %v1841_v27 = vpop.eup %1840  ;;  %v1064_v29 = vmul.f32 %v1839_v26, %v1829_v5  ;;  %v1822_v26 = vld [vmem:[%s2545_s11] ss:$0 sm:$0xff] }
 0x2cd   : > { %v1069_v25 = vpack.c.bf16 %v1065_v22, %v1065_v22  ;;  %v1066_v32 = vmul.f32 %v1841_v27, %v1831_v8 }
 0x2ce   : > { %v1114_v24 = vsel %vm1074_vm2, %v944_v23, 0  ;;  %v1068_v36 = vpack.c.bf16 %v1064_v29, %v1064_v29 }
 0x2cf   : > { %1123 = vmatpush.bf16.msra.mxu1 %v1114_v24  ;;  %v1070_v37 = vpack.c.bf16 %v1066_v32, %v1066_v32 }
 0x2d2   : > { %1641 = vmatmul.msk.bf16.vlgmr.msra.gmra.mxu1 %vm946_vm1, %v1069_v25 }
 0x2d3   : > { %v934_v28 = vpop.permute.xlu1 %933 }
 0x2d4   : > { %v943_v30 = vpack.c.bf16 %v934_v28, %v934_v28  ;;  %v940_v31 = vpop.permute.xlu0 %939  ;;  %v1823_v28 = vld [vmem:[%s2546_s12] ss:$0 sm:$0xff] }
 0x2d5   : > { %v945_v33 = vpack.c.bf16 %v940_v31, %v940_v31 }
 0x2d6   : > { %v1095_v34 = vsel %vm1074_vm2, %v943_v30, 0 }
 0x2d7   : > { %v1133_v35 = vsel %vm1074_vm2, %v945_v33, 0  ;;  %1104 = vmatpush.bf16.msra.mxu0 %v1095_v34  ;;  %v1695_v33 = vld [vmem:[%s2549_s15 + $0x8] sm:$0xff]  ;;  %v1694_v34 = vld [vmem:[%s2549_s15] sm:$0xff] }
 0x2d8   : > { %1142 = vmatpush.bf16.msra.mxu2 %v1133_v35  ;;  %v1824_v35 = vld [vmem:[%s2548_s14] ss:$0 sm:$0xff] }
 0x2da   : > { %1640 = vmatmul.msk.bf16.vlgmr.msra.gmra.mxu0 %vm946_vm1, %v1068_v36 }
 0x2db   : > { %1642 = vmatmul.msk.bf16.vlgmr.msra.gmra.mxu2 %vm946_vm1, %v1070_v37  ;;  %1273 = vmatpush.bf16.msrb.mxu0 %v1693_v13 }
 0x2df   : > { %1274 = vmatpush.bf16.msrb.mxu0 %v1692_v14 }
 0x2ff   : > { %v1049_v38 = vpop.xlane.xlu0 %1048 }
 0x300   : > { %1842 = vrcp.f32 %v1049_v38 }
 0x301   : > { %1844 = vrcp.f32 %v2137_v1 }
 0x306   : > { %v1843_v39 = vpop.eup %1842 }
 0x307   : > { %v1063_v40 = vmul.f32 %v1843_v39, %v1835_v15  ;;  %v1845_v2 = vpop.eup %1844  ;;  %v1697_v15 = vld [vmem:[%s2549_s15 + $0x18] sm:$0xff] }
 0x308   : > { %v1210_v3 = vmul.f32 32.0, %v1845_v2  ;;  %vm1214_vm5 = vweird.f32 %v1845_v2  ;;  %1326 = vmatpush.bf16.msrb.mxu1 %v1697_v15 }
 0x309   : > { %v1067_v41 = vpack.c.bf16 %v1063_v40, %v1063_v40 }
 0x30a   : > { %v1211_v5 = vsub.f32 1.0, %v1210_v3 }
 0x30b   : > { %1639 = vmatmul.msk.bf16.vlgmr.msrb.gmra.mxu3 %vm946_vm1, %v1067_v41  ;;  %v1825_v41 = vld [vmem:[%s2550_s16] ss:$0 sm:$0xff] }
 0x30c   : > { %v1212_v6 = vmul.f32 %v1845_v2, %v1211_v5  ;;  %1327 = vmatpush.bf16.msrb.mxu1 %v1696_v18 }
 0x30e   : > { %v1213_v7 = vadd.f32 %v1845_v2, %v1212_v6 }
 0x310   : > { %v2435_v8 = vsel %vm1214_vm5, %v1845_v2, %v1213_v7  ;;  %1328 = vmatpush.bf16.msrb.mxu1 %v1695_v33 }
 0x314   : > { %1329 = vmatpush.bf16.msrb.mxu1 %v1694_v34 }
 0x34f   : > { %v1125_v42 = vpop.f32.mrf.mxu1 }
 0x350   : > { %1153 = vrot.lane.b32.xlu2 %v1125_v42, %s2134_s20 }
 0x357   : > { %v1106_v43 = vpop.f32.mrf.mxu0  ;;  %v1127_v44 = vpop.f32.mrf.mxu1 }
 0x358   : > { %1149 = vrot.lane.b32.xlu1 %v1106_v43, %s2135_s28 }
 0x35e   : > { %v1144_v45 = vpop.f32.mrf.mxu2 }
 0x35f   : > { %v1108_v46 = vpop.f32.mrf.mxu0 }
 0x360   : > { %1157 = vrot.lane.b32.xlu1 %v1144_v45, %s2136_s26  ;;  %s2020_s26 = scalar_lea.hbm %s2598_s5, 16 }
 0x361   : > { %p2022_p6 = scmp.lt.s32.totalorder %s2020_s26, %s2016_s21 }
 0x363   : > { %p2023_p7 = por %p2022_p6, %p2021_p5 }
 0x365   : > { %p2024_p9 = pnand %p2023_p7, %p2019_p3 }
 0x366   : > { %v1146_v47 = vpop.f32.mrf.mxu2 }
 0x38e   : > { %v1087_v48 = vpop.f32.mrf.mxu3 }
 0x396   : > { %v1089_v49 = vpop.f32.mrf.mxu3 }
 0x3aa   : > { %v1154_v54 = vpop.permute.xlu2 %1153 }
 0x3ca   : > { %v1150_v52 = vpop.permute.xlu1 %1149 }
 0x3cb   : > { %v1160_v53 = vsel %vm946_vm1, %v1087_v48, %v1150_v52 }
 0x3cc   : > { %v1162_v56 = vsel %vm1161_vm3, %v1160_v53, %v1154_v54 }
 0x3d2   : > { %v1158_v55 = vpop.permute.xlu1 %1157 }
 0x3d3   : > { %v1164_v57 = vsel %vm1163_vm4, %v1162_v56, %v1158_v55 }
 0x3d4   : > { %v1166_v58 = vpack.c.bf16 %v1164_v57, %v1164_v57  ;;  %1165 = vst.msk [vmem:[%s2425_s1] sm:$0xff] %vm817_vm0, %v1164_v57 }
 0x3d6   : > { %1651 = vmatmul.msk.bf16.vlgmr.msra.gmra.mxu3 %vm817_vm0, %v1166_v58 }
 0x459   : > { %v1199_v60 = vpop.f32.mrf.mxu3 }
 0x45a   : > { %v1200_v61 = vadd.f32 %v1821_v59, %v1199_v60 }
 0x45c   : > { %v1203_v62 = vadd.f32 %v1200_v61, %v2365_v4 }
 0x45e   : > { %v1206_v63 = vsel %vm817_vm0, %v1203_v62, 0.0 }
 0x45f   : > { %1207 = vadd.xlane.f32.xlu2 %v1206_v63 }
 0x461   : > { %v1201_v0 = vpop.f32.mrf.mxu3 }
 0x4d2   : > { %v1208_v9 = vpop.xlane.xlu2 %1207 }
 0x4d3   : > { %v1216_v10 = vmul.f32 %v2435_v8, %v1208_v9 }
 0x4d5   : > { %v1217_v11 = vsub.f32 %v1203_v62, %v1216_v10 }
 0x4d7   : > { %v1218_v12 = vmul.f32 %v1217_v11, %v1217_v11 }
 0x4d9   : > { %v1219_v4 = vsel %vm817_vm0, %v1218_v12, 0.0 }
 0x4da   : > { %1220 = vadd.xlane.f32.xlu1 %v1219_v4 }
 0x54d   : > { %v1221_v16 = vpop.xlane.xlu1 %1220 }
 0x54e   : > { %v1222_v17 = vmul.f32 %v1221_v16, %v2435_v8 }
 0x550   : > { %v1223_v19 = vadd.f32 1e-05, %v1222_v17 }
 0x552   : > { %1846 = vrsqrt.f32 %v1223_v19  ;;  %vm1230_vm7 = vweird.f32 %v1223_v19 }
 0x558   : > { %v1847_v20 = vpop.eup %1846 }
 0x559   : > { %v1225_v21 = vmul.f32 %v1847_v20, %v1223_v19  ;;  %vm1231_vm6 = vweird.f32 %v1847_v20 }
 0x55a   : > { %vm1232_vm8 = vmor %vm1230_vm7, %vm1231_vm6 }
 0x55b   : > { %v1226_v22 = vmul.f32 %v1847_v20, %v1225_v21 }
 0x55d   : > { %v1227_v23 = vmul.f32 0.5, %v1226_v22 }
 0x55f   : > { %v1228_v24 = vsub.f32 1.5, %v1227_v23 }
 0x561   : > { %v1229_v25 = vmul.f32 %v1847_v20, %v1228_v24 }
 0x563   : > { %v1233_v27 = vsel %vm1232_vm8, %v1847_v20, %v1229_v25 }
 0x564   : > { %v1234_v29 = vmul.f32 %v1233_v27, %v1217_v11 }
 0x566   : > { %v1238_v30 = vmul.f32 %v1822_v26, %v1234_v29 }
 0x568   : > { %v1242_v31 = vadd.f32 %v1823_v28, %v1238_v30 }
 0x56a   : > { %v1243_v32 = vpack.c.bf16 %v1242_v31, %v1242_v31 }
 0x56c   : > { %1660 = vmatmul.msk.bf16.vlgmr.msrb.gmra.mxu0 %vm817_vm0, %v1243_v32 }
 0x5e9   : > { %v1276_v36 = vpop.f32.mrf.mxu0 }
 0x5ea   : > { %v1277_v37 = vadd.f32 %v1824_v35, %v1276_v36 }
 0x5ec   : > { %v1280_v38 = vmax.f32 %v1277_v37, 0.0 }
 0x5ee   : > { %v1281_v39 = vpack.c.bf16 %v1280_v38, %v1280_v38 }
 0x5f0   : > { %1677 = vmatmul.msk.bf16.vlgmr.msrb.gmra.mxu1 %vm1318_vm9, %v1281_v39 }
 0x5f1   : > { %v1278_v40 = vpop.f32.mrf.mxu0 }
 0x66d   : > { %v1331_v42 = vpop.f32.mrf.mxu1 }
 0x66e   : > { %v1332_v43 = vadd.f32 %v1825_v41, %v1331_v42 }
 0x670   : > { %v1335_v44 = vadd.f32 %v1332_v43, %v1242_v31 }
 0x672   : > { %v1338_v45 = vsel %vm817_vm0, %v1335_v44, 0.0 }
 0x673   : > { %1339 = vadd.xlane.f32.xlu0 %v1338_v45 }
 0x675   : > { %v1333_v46 = vpop.f32.mrf.mxu1 }
 0x6e6   : > { %v1340_v47 = vpop.xlane.xlu0 %1339 }
 0x6e7   : > { %v1341_v48 = vmul.f32 %v1340_v47, %v2435_v8 }
 0x6e9   : > { %v1342_v49 = vsub.f32 %v1335_v44, %v1341_v48 }
 0x6eb   : > { %v1343_v50 = vmul.f32 %v1342_v49, %v1342_v49 }
 0x6ed   : > { %v1344_v51 = vsel %vm817_vm0, %v1343_v50, 0.0 }
 0x6ee   : > { %1345 = vadd.xlane.f32.xlu0 %v1344_v51 }
 0x6ef   : > { %2027 = shalt.err (!%p2024_p9)
}
 0x6f0   : > { %1719 = dma.vmem_to_hbm [thread:$0]  (%p2283_p4), %s1404_s9, 128, %s1406_s25, %s1375_s4  }
 0x6f1   : > { %s2599_s17 = sld [smem:[#allocation34_spill]]  ;;  %s765_s26 = scalar_lea.vmem [#allocation11], %s1603_s2 }
 0x6f2   : > { %s2600_s25 = sld [smem:[#allocation36_spill]]  ;;  %s1388_s0 = sshll.u32 %s765_s26, 4  ;;  %s1389_s0 = int_to_ptr.vmem [resolvable:$true] %s1388_s0 }
 0x6f3   : > { %s2602_s28 = sld [smem:[#allocation35_spill]]  ;;  %s1370_s24 = scalar_lea.sflag [#allocation4], %s2419_s23 }
 0x6f7   : > { %v1826_v61 = vld [vmem:[%s2599_s17] ss:$0 sm:$0xff] }
 0x6f8   : > { %s2601_s4 = smov %s2600_s25  ;;  %s1386_s30 = scalar_lea.hbm %s2600_s25, %s1680_s29 }
 0x6f9   : > { %v1827_v0 = vld [vmem:[%s2602_s28] ss:$0 sm:$0xff]  ;;  %s1390_s27 = sshll.u32 %s1386_s30, 4  ;;  %s2048_s2 = scalar_lea.hbm %s2601_s4, 16  ;;  %s1391_s27 = int_to_ptr.hbm [resolvable:$true] %s1390_s27 }
 0x6fa   : > { %s2042_s1 = sshra.s32 %s1391_s27, 4  ;;  %s2043_s1 = int_to_ptr.hbm [resolvable:$true] %s2042_s1 }
 0x6fb   : > { %s2044_s29 = scalar_lea.hbm %s2043_s1, 8  ;;  %p2049_p13 = scmp.lt.s32.totalorder %s2043_s1, %s2601_s4 }
 0x6fc   : > { %p2045_p10 = scmp.ne.s32.totalorder %s2043_s1, %s2044_s29  ;;  %p2050_p0 = scmp.lt.s32.totalorder %s2048_s2, %s2044_s29 }
 0x6fe   : > { %p2046_p11 = pnand %p2045_p10, %p2283_p4  ;;  %p2051_p1 = por %p2050_p0, %p2049_p13 }
 0x700   : > { %p2047_p12 = pneg %p2046_p11 }
 0x702   : > { %p2052_p2 = pnand %p2051_p1, %p2047_p12 }
 0x761   : > { %v1346_v52 = vpop.xlane.xlu0 %1345 }
 0x762   : > { %v1347_v53 = vmul.f32 %v1346_v52, %v2435_v8 }
 0x764   : > { %v1348_v54 = vadd.f32 1e-05, %v1347_v53 }
 0x766   : > { %1848 = vrsqrt.f32 %v1348_v54  ;;  %vm1355_vm11 = vweird.f32 %v1348_v54 }
 0x76c   : > { %v1849_v55 = vpop.eup %1848 }
 0x76d   : > { %v1350_v56 = vmul.f32 %v1849_v55, %v1348_v54  ;;  %vm1356_vm10 = vweird.f32 %v1849_v55 }
 0x76e   : > { %vm1357_vm12 = vmor %vm1355_vm11, %vm1356_vm10 }
 0x76f   : > { %v1351_v57 = vmul.f32 %v1849_v55, %v1350_v56 }
 0x771   : > { %v1352_v58 = vmul.f32 0.5, %v1351_v57 }
 0x773   : > { %v1353_v59 = vsub.f32 1.5, %v1352_v58 }
 0x775   : > { %v1354_v60 = vmul.f32 %v1849_v55, %v1353_v59 }
 0x777   : > { %v1358_v62 = vsel %vm1357_vm12, %v1849_v55, %v1354_v60 }
 0x778   : > { %v1359_v63 = vmul.f32 %v1358_v62, %v1342_v49 }
 0x77a   : > { %v1363_v1 = vmul.f32 %v1826_v61, %v1359_v63 }
 0x77c   : > { %v1367_v2 = vadd.f32 %v1827_v0, %v1363_v1 }
 0x77e   : > { %1368 = vst.msk [vmem:[%s765_s26] sm:$0xff] %vm817_vm0, %v1367_v2 }
 0x77f   : > { %2055 = shalt.err (!%p2052_p2)
}
 0x780   : > { %1718 = dma.vmem_to_hbm [thread:$0]  (%p2283_p4), %s1389_s0, 128, %s1391_s27, %s1370_s24  }
 0x781 PF: > { %s2603_s23 = sld [smem:[#allocation22_spill]] }
 0x782   : > { %s2604_s25 = sld [smem:[#allocation19_spill]] }
 0x787   : > { %p1755_p3 = scmp.ge.s32.totalorder %s2603_s23, 2 }
 0x788   : > { %s1417_s21 = sand.u32 1, %s2604_s25  }
 0x789   : > { %p1739_p5 = pnand %p1755_p3, %p2290_p8  ;;  %s1418_s20 = scalar_lea.sflag [#allocation4], %s1417_s21 }
 0x78b   : > { %p1740_p6 = pneg %p1739_p5 }
 0x78d   : > { %2093 = dma.done.wait (%p1740_p6), %s1418_s20, 128  }
 0x78e   : > { %2095 = vsyncadd (%p1740_p6), %s1418_s20, 4294967168  ;;  %s1428_s28 = scalar_lea.sflag [#allocation13], %s1417_s21 }
 0x78f   : > { %2097 = dma.done.wait (%p1740_p6), %s1428_s28, 128  }
 0x790   : > { %2099 = vsyncadd (%p1740_p6), %s1428_s28, 4294967168  ;;  %s40_s25 = sadd.s32 1, %s2603_s23   ;;  %s2606_s3 = sld [smem:[#allocation20_spill]] }
 0x791   : > { %p37_p7 = scmp.ge.s32.totalorder %s40_s25, 4   ;;  %s2607_s23 = sld [smem:[#allocation26_spill]] }
 0x792   : > { %s2608_s24 = sld [smem:[#allocation21_spill]]  ;;  %s2610_s1 = smov %s2106_s22 }
 0x793   : > { %s2609_s2 = sld [smem:[#allocation23_spill]]  ;;  %39 = sbr.rel (!%p37_p7) target bundleno = 21 (0x15), region = 175 }
 0x796   : > { %s2611_s22 = smov %s2606_s3 }
 0x798   :  { %1434 = vsyncpa [#allocation3], 1 }
 0x799   :  { %1436 = vsyncpa [#allocation3 + $0x1], 1 }
 0x79a   :  { %1437 = vsyncpa [#allocation6], 1 }
 0x79b   :  { %1438 = vsyncpa [#allocation9], 1 }
 0x79c   :  { %1439 = vsyncpa [#allocation4], 1 }
 0x79d   :  { %1441 = vsyncpa [#allocation4 + $0x1], 1 }
 0x79e   :  { %1442 = vsyncpa [#allocation13], 1 }
 0x79f   :  { %1444 = vsyncpa [#allocation13 + $0x1], 1 }

</bundles_post_ra>
